<compile_context>
chip_gen: v7x
topology: tpu7x:2x2x1
jax: 0.10.0
libtpu: 0.0.40
codegen_flags: <defaults>
</compile_context>

<pallas_src>
import jax
import jax.numpy as jnp
from jax.experimental import pallas as pl
from jax.experimental.pallas import tpu as pltpu


def _linear1_kernel(x_ref, w_ref, b_ref, o_ref):
    # x_ref: (TN, 1), w_ref: (1, E), b_ref: (1, E), o_ref: (TN, E)
    # Broadcast outer-product + bias, all on the VPU.
    o_ref[...] = x_ref[...] * w_ref[...] + b_ref[...]


def power_model_forward(x, weight, bias, *, max_out_tile_bytes=8 << 20):
    """x: (N, 1); weight: (E, 1) (PyTorch layout); bias: (E,)  ->  (N, E)."""
    N, K = x.shape
    assert K == 1, "PowerModel uses nn.Linear(1, embed_size)"
    E = weight.shape[0]

    w_t = weight.reshape(1, E).astype(x.dtype)  # (1, E)
    b_r = bias.reshape(1, E).astype(x.dtype)    # (1, E)

    itemsize = jnp.dtype(x.dtype).itemsize
    total_out_bytes = N * E * itemsize

    compiler_params = pltpu.CompilerParams(
        dimension_semantics=("parallel",),
        # 2x-buffered <=8 MiB output tile + resident w/b stays well inside
        # 32 MiB -> safe on v7x (64 MiB physical) and needed on v5e (16 MiB
        # scoped default).
        vmem_limit_bytes=32 << 20,
    )

    # ---- small-problem fast path: one grid step, full-array blocks ----
    if total_out_bytes <= max_out_tile_bytes or N < 8:
        return pl.pallas_call(
            _linear1_kernel,
            out_shape=jax.ShapeDtypeStruct((N, E), x.dtype),
            grid_spec=pltpu.PrefetchScalarGridSpec(
                num_scalar_prefetch=0,
                grid=(1,),
                in_specs=[
                    pl.BlockSpec((N, 1), lambda i: (0, 0)),
                    pl.BlockSpec((1, E), lambda i: (0, 0)),
                    pl.BlockSpec((1, E), lambda i: (0, 0)),
                ],
                out_specs=pl.BlockSpec((N, E), lambda i: (0, 0)),
            ),
            compiler_params=compiler_params,
        )(x, w_t, b_r)

    # ---- large-problem path: tile over N only, lane-dense full-E output ----
    rows_per_tile = max_out_tile_bytes // (E * itemsize)
    tile_n = max(8, (rows_per_tile // 8) * 8)       # multiple of 8 sublanes
    tile_n = min(tile_n, max(8, (N // 8) * 8))      # don't exceed N (rounded)

    grid = (pl.cdiv(N, tile_n),)                    # partial last block is masked

    return pl.pallas_call(
        _linear1_kernel,
        out_shape=jax.ShapeDtypeStruct((N, E), x.dtype),
        grid_spec=pltpu.PrefetchScalarGridSpec(
            num_scalar_prefetch=0,
            grid=grid,
            in_specs=[
                pl.BlockSpec((tile_n, 1), lambda i: (i, 0)),   # x: per-row-tile
                pl.BlockSpec((1, E), lambda i: (0, 0)),        # w: resident
                pl.BlockSpec((1, E), lambda i: (0, 0)),        # b: resident
            ],
            out_specs=pl.BlockSpec((tile_n, E), lambda i: (i, 0)),
        ),
        compiler_params=compiler_params,
    )(x, w_t, b_r)


if __name__ == "__main__":
    embed_size = 512
    batch = 8

    key = jax.random.PRNGKey(0)
    kx, kw, kb = jax.random.split(key, 3)

    # Deterministic synthetic parameters (shapes from nn.Linear(1, embed_size)).
    weight = jax.random.normal(kw, (embed_size, 1), dtype=jnp.float32) * 0.02
    bias = jax.random.normal(kb, (embed_size,), dtype=jnp.float32) * 0.02
    x = jax.random.normal(kx, (batch, 1), dtype=jnp.float32)

    out = power_model_forward(x, weight, bias)
    out = jax.block_until_ready(out)

    # Reference check in plain JAX (same math as PyTorch's linear).
    ref = x @ weight.T + bias[None, :]
    assert out.shape == (batch, embed_size)
    assert jnp.allclose(out, ref, atol=1e-5, rtol=1e-5)

    # Also exercise the tiled (large-N) path, including a partial last block.
    big_n = 8192 + 40
    xb = jax.random.normal(kx, (big_n, 1), dtype=jnp.float32)
    outb = jax.block_until_ready(power_model_forward(xb, weight, bias))
    refb = xb @ weight.T + bias[None, :]
    assert outb.shape == (big_n, embed_size)
    assert jnp.allclose(outb, refb, atol=1e-5, rtol=1e-5)

    print("KERNEL_OK")
</pallas_src>

<mosaic_0001>
module attributes {stable_mosaic.version = 11 : i64} {
  func.func @_linear1_kernel(%arg0: i32, %arg1: memref<8x1xf32, #tpu.memory_space<vmem>>, %arg2: memref<1x512xf32, #tpu.memory_space<vmem>>, %arg3: memref<1x512xf32, #tpu.memory_space<vmem>>, %arg4: memref<8x512xf32, #tpu.memory_space<vmem>>) attributes {dimension_semantics = [#tpu.dimension_semantics<parallel>], iteration_bounds = array<i64: 1>, scalar_prefetch = 0 : i64, scratch_operands = 0 : i64, tpu.core_type = #tpu.core_type<tc>, window_params = [{pipeline_mode = #tpu.pipeline_mode<synchronous>, transform_indices = @transform_0, window_bounds = array<i64: 8, 1>}, {pipeline_mode = #tpu.pipeline_mode<synchronous>, transform_indices = @transform_1, window_bounds = array<i64: 1, 512>}, {pipeline_mode = #tpu.pipeline_mode<synchronous>, transform_indices = @transform_2, window_bounds = array<i64: 1, 512>}, {pipeline_mode = #tpu.pipeline_mode<synchronous>, transform_indices = @transform_3, window_bounds = array<i64: 8, 512>}]} {
    %c0 = arith.constant 0 : index
    %c0_0 = arith.constant 0 : index
    %0 = vector.load %arg1[%c0, %c0_0] : memref<8x1xf32, #tpu.memory_space<vmem>>, vector<8x1xf32>
    %c0_1 = arith.constant 0 : index
    %c0_2 = arith.constant 0 : index
    %1 = vector.load %arg2[%c0_1, %c0_2] : memref<1x512xf32, #tpu.memory_space<vmem>>, vector<1x512xf32>
    %2 = vector.broadcast %0 : vector<8x1xf32> to vector<8x512xf32>
    %3 = vector.broadcast %1 : vector<1x512xf32> to vector<8x512xf32>
    %4 = arith.mulf %2, %3 : vector<8x512xf32>
    %c0_3 = arith.constant 0 : index
    %c0_4 = arith.constant 0 : index
    %5 = vector.load %arg3[%c0_3, %c0_4] : memref<1x512xf32, #tpu.memory_space<vmem>>, vector<1x512xf32>
    %6 = vector.broadcast %5 : vector<1x512xf32> to vector<8x512xf32>
    %7 = arith.addf %4, %6 : vector<8x512xf32>
    %c0_5 = arith.constant 0 : index
    %c0_6 = arith.constant 0 : index
    %8 = vector.load %arg4[%c0_5, %c0_6] : memref<8x512xf32, #tpu.memory_space<vmem>>, vector<8x512xf32>
    tpu.vector_store %arg4[%c0_5, %c0_6], %7 {strides = array<i32>} : memref<8x512xf32, #tpu.memory_space<vmem>>, vector<8x512xf32>,
    return
  }
  func.func @transform_0(%arg0: i32) -> (i32, i32) {
    %c0_i32 = arith.constant 0 : i32
    %c0_i32_0 = arith.constant 0 : i32
    %c0_i32_1 = arith.constant 0 : i32
    return %c0_i32, %c0_i32_0 : i32, i32
  }
  func.func @transform_1(%arg0: i32) -> (i32, i32) {
    %c0_i32 = arith.constant 0 : i32
    %c0_i32_0 = arith.constant 0 : i32
    %c0_i32_1 = arith.constant 0 : i32
    return %c0_i32, %c0_i32_0 : i32, i32
  }
  func.func @transform_2(%arg0: i32) -> (i32, i32) {
    %c0_i32 = arith.constant 0 : i32
    %c0_i32_0 = arith.constant 0 : i32
    %c0_i32_1 = arith.constant 0 : i32
    return %c0_i32, %c0_i32_0 : i32, i32
  }
  func.func @transform_3(%arg0: i32) -> (i32, i32) {
    %c0_i32 = arith.constant 0 : i32
    %c0_i32_0 = arith.constant 0 : i32
    %c0_i32_1 = arith.constant 0 : i32
    return %c0_i32, %c0_i32_0 : i32, i32
  }
}

</mosaic_0001>

<bundles_post_ra>
// kernel: tpu_custom_call.1
= control target key start
LH: loop header
LB: loop body
LE: loop exit
PB: predicated region body
PF: predicated region fallthrough
CT: control target
= control target key end

     0   :  { %v118_v1 = vmov 0   ;;  %s161_s0 = inlined_call_operand.vmem [shape: f32[8,1], index: 0, kind: input, shape index: {}]   ;;  %s162_s1 = inlined_call_operand.vmem [shape: f32[1,512], index: 1, kind: input, shape index: {}]   ;;  %s163_s2 = inlined_call_operand.vmem [shape: f32[1,512], index: 2, kind: input, shape index: {}]   ;;  %s164_s3 = inlined_call_operand.hbm [shape: f32[8,512], index: 3, kind: output, shape index: {}]  }
   0x1   :  { %v15_v0 = vld [vmem:[%s161_s0] sm:$0xff]  ;;  %93 = vset.pattern.permute.xlu0 %v118_v1 }
   0x2   :  { %8 = vsyncpa [#allocation3], 0  ;;  %19 = vperm.xlu0 %93, %v15_v0   ;;  %v23_v2 = vlaneseq  ;;  %v16_v8 = vld [vmem:[%s162_s1] sm:$0xf]  ;;  %s119_s0 = smov [#allocation2]  }
   0x3   :  { %v47_v9 = vld [vmem:[%s163_s2] sm:$0xf]  ;;  %s83_s18 = sshll.u32 %s119_s0, 4  ;;  %s84_s18 = int_to_ptr.vmem [resolvable:$true] %s83_s18 }
   0x4   :  { %v24_v3 = vshrl.u32 %v23_v2, 7  ;;  %s94_s1 = scalar_lea.vmem %s84_s18, 512  ;;  %p99_p1 = scmp.lt.s32.totalorder %s84_s18, %s84_s18 }
   0x5   :  { %p95_p0 = scmp.ne.s32.totalorder %s84_s18, %s94_s1  ;;  %p100_p2 = scmp.lt.s32.totalorder %s94_s1, %s94_s1 }
   0x6   :  { %v25_v4 = vsub.s32 0, %v24_v3  ;;  %v29_v5 = vsub.s32 1, %v24_v3  ;;  %v33_v6 = vsub.s32 2, %v24_v3  ;;  %v37_v7 = vsub.s32 3, %v24_v3 }
   0x7   :  { %p101_p3 = por %p100_p2, %p99_p1 }
   0x8   :  { %v26_v10 = vrot.slane %v16_v8, %v25_v4  ;;  %v30_v11 = vrot.slane %v16_v8, %v29_v5  ;;  %v34_v12 = vrot.slane %v16_v8, %v33_v6  ;;  %v38_v13 = vrot.slane %v16_v8, %v37_v7 }
   0x9   :  { %v52_v14 = vrot.slane %v47_v9, %v25_v4  ;;  %v56_v15 = vrot.slane %v47_v9, %v29_v5  ;;  %v60_v16 = vrot.slane %v47_v9, %v33_v6  ;;  %v64_v17 = vrot.slane %v47_v9, %v37_v7  ;;  %p102_p4 = pnand %p101_p3, %p95_p0 }
  0x81   :  { %v20_v18 = vpop.permute.xlu0 %19 }
  0x82   :  { %v43_v19 = vmul.f32 %v26_v10, %v20_v18  ;;  %v44_v20 = vmul.f32 %v30_v11, %v20_v18  ;;  %v45_v21 = vmul.f32 %v34_v12, %v20_v18  ;;  %v46_v22 = vmul.f32 %v38_v13, %v20_v18 }
  0x84   :  { %v69_v23 = vadd.f32 %v52_v14, %v43_v19  ;;  %v70_v24 = vadd.f32 %v56_v15, %v44_v20  ;;  %v71_v25 = vadd.f32 %v60_v16, %v45_v21  ;;  %v72_v26 = vadd.f32 %v64_v17, %v46_v22 }
  0x86   :  { %73 = vst [vmem:[#allocation2] sm:$0xff] %v69_v23  ;;  %74 = vst [vmem:[#allocation2 + $0x8] sm:$0xff] %v70_v24 }
  0x87   :  { %75 = vst [vmem:[#allocation2 + $0x10] sm:$0xff] %v71_v25  ;;  %76 = vst [vmem:[#allocation2 + $0x18] sm:$0xff] %v72_v26 }
  0x88   :  { %105 = shalt.err (!%p102_p4)
}
  0x89   :  { %s106_s20 = scalar_lea.hbm %s164_s3, 512 }
  0x8a   :  { %p107_p5 = scmp.ne.s32.totalorder %s164_s3, %s106_s20  ;;  %p110_p6 = scmp.lt.u32.totalorder %s106_s20, %s164_s3 }
  0x8c   :  { %p112_p7 = pnand %p110_p6, %p107_p5 }
  0x8e   :  { %115 = shalt.err (!%p112_p7)
}
  0x8f   :  { %86 = dma.vmem_to_hbm [thread:$0]  %s84_s18, 512, %s164_s3, [#allocation3]  }
  0x90   :  { %116 = dma.done.wait [#allocation3], 512  }
  0x91   :  { %117 = vsyncadd [#allocation3], 4294966784 }
  0x92   :  { %90 = vsyncpa [#allocation3], 1 }

</bundles_post_ra>
